<compile_context>
chip_gen: v7x
topology: tpu7x:2x2x1
jax: 0.10.0
libtpu: 0.0.40
codegen_flags: <defaults>
</compile_context>

<pallas_src>
import jax
import jax.numpy as jnp
import numpy as np
from jax.experimental import pallas as pl
from jax.experimental.pallas import tpu as pltpu

IN_DIM = 3      # concat([x(2), t(1)])
X_DIM = 2
T_DIM = 1
HIDDEN = 64
OUT_DIM = 2


def mlp_kernel(xt_ref, w1_ref, b1_ref, w2_ref, b2_ref, w3t_ref, b3_ref, o_ref):
    """One batch tile of the fused 3-layer MLP. Weights are VMEM-resident."""
    xt = xt_ref[...]                   # (TB, 3) f32
    w1 = w1_ref[...]                   # (3, 64) f32

    # Layer 1: K=3, done as broadcast FMAs on the VPU (avoids padding the input to 128
    # and spending MXU cycles multiplying zeros).
    h1 = (xt[:, 0:1] * w1[0:1, :]
          + xt[:, 1:2] * w1[1:2, :]
          + xt[:, 2:3] * w1[2:3, :]
          + b1_ref[...])
    h1 = jnp.maximum(h1, 0.0)          # ReLU

    # Layer 2: (TB,64) @ (64,64) on the MXU. In the bf16 production path w2 is bf16;
    # casting h1 to w2's dtype is a no-op for the f32 verification path. Accumulation
    # is always f32 via preferred_element_type.
    h2 = (jnp.dot(h1.astype(w2_ref.dtype), w2_ref[...],
                  preferred_element_type=jnp.float32)
          + b2_ref[...])
    h2 = jnp.maximum(h2, 0.0)          # ReLU

    # Layer 3 (64 -> 2): kept OFF the MXU. Two VPU multiplies + XLU lane reductions —
    # the VPU/XLU slots have slack, the MXU issue stream is the binding resource.
    w3t = w3t_ref[...]                 # (2, 64) f32 (transposed so rows broadcast on lanes)
    o0 = jnp.sum(h2 * w3t[0:1, :], axis=-1, keepdims=True)   # (TB, 1)
    o1 = jnp.sum(h2 * w3t[1:2, :], axis=-1, keepdims=True)   # (TB, 1)
    o_ref[...] = (jnp.concatenate([o0, o1], axis=-1)
                  + b3_ref[...]).astype(o_ref.dtype)


def init_params(key):
    """Deterministic init mimicking PyTorch's default Linear init (U(-1/sqrt(fan_in), ...))."""
    keys = jax.random.split(key, 6)

    def linear(kw, kb, fan_in, fan_out):
        bound = 1.0 / np.sqrt(fan_in)
        w = jax.random.uniform(kw, (fan_in, fan_out), jnp.float32, -bound, bound)
        b = jax.random.uniform(kb, (fan_out,), jnp.float32, -bound, bound)
        return w, b

    w1, b1 = linear(keys[0], keys[1], IN_DIM, HIDDEN)
    w2, b2 = linear(keys[2], keys[3], HIDDEN, HIDDEN)
    w3, b3 = linear(keys[4], keys[5], HIDDEN, OUT_DIM)
    return (w1, b1, w2, b2, w3, b3)


def _round_up(n, m):
    return ((n + m - 1) // m) * m


def vector_field_forward(x, t, params, *, block_b=2048, use_bf16=False,
                         core_parallel=False):
    """x: (B, 2), t: (B, 1) -> (B, 2) float32.

    use_bf16=True runs layer-2 on the MXU in bf16 (f32 accumulation) — production path,
    not bit-matched to the f32 reference. core_parallel=True is for v7x (2 TCs/chip).
    """
    w1, b1, w2, b2, w3, b3 = params

    # Single fused (B, 3) input: one batch-tiled ref -> fewer per-step DMA descriptors.
    xt = jnp.concatenate([x.astype(jnp.float32), t.astype(jnp.float32)], axis=1)
    B = xt.shape[0]

    # Batch tile = MXU M dimension. Multiple of 16 (valid for f32 sublane=8 and bf16
    # packing=16), capped by block_b. Per-step VMEM footprint at TB=2048 is ~1.1 MiB
    # (h1/h2 strips) + ~20 KiB resident weights — trivial on every generation.
    TB = min(block_b, _round_up(B, 16))
    Bp = _round_up(B, TB)
    if Bp != B:
        # Padded rows produce bias-only garbage, discarded by the final row slice.
        xt = jnp.pad(xt, ((0, Bp - B), (0, 0)))

    mxu_dtype = jnp.bfloat16 if use_bf16 else jnp.float32
    w1r = w1.astype(jnp.float32)                  # layer 1 is VPU FMAs: keep f32
    w2r = w2.astype(mxu_dtype)                    # layer 2 is the MXU matmul
    w3tr = w3.T.astype(jnp.float32)               # (2, 64): rows broadcast along lanes
    b1r = b1.reshape(1, HIDDEN).astype(jnp.float32)
    b2r = b2.reshape(1, HIDDEN).astype(jnp.float32)
    b3r = b3.reshape(1, OUT_DIM).astype(jnp.float32)

    def batch_spec(cols):
        # Batch-tiled array: block index advances with the grid step.
        return pl.BlockSpec((TB, cols), lambda i: (i, 0))

    def resident(shape):
        # Constant block index -> the (tiny) weights/biases stay resident in VMEM.
        return pl.BlockSpec(shape, lambda i: (0, 0))

    flops = 2 * Bp * (IN_DIM * HIDDEN + HIDDEN * HIDDEN + HIDDEN * OUT_DIM)
    bytes_accessed = 4 * (Bp * (IN_DIM + OUT_DIM)
                          + IN_DIM * HIDDEN + HIDDEN * HIDDEN + HIDDEN * OUT_DIM
                          + 2 * HIDDEN + OUT_DIM)

    batch_sem = pltpu.CORE_PARALLEL if core_parallel else "parallel"

    out = pl.pallas_call(
        mlp_kernel,
        out_shape=jax.ShapeDtypeStruct((Bp, OUT_DIM), jnp.float32),
        grid=(Bp // TB,),
        in_specs=[
            batch_spec(IN_DIM),                                    # xt
            resident((IN_DIM, HIDDEN)), resident((1, HIDDEN)),     # W1, b1
            resident((HIDDEN, HIDDEN)), resident((1, HIDDEN)),     # W2, b2
            resident((OUT_DIM, HIDDEN)), resident((1, OUT_DIM)),   # W3^T, b3
        ],
        out_specs=batch_spec(OUT_DIM),
        compiler_params=pltpu.CompilerParams(
            dimension_semantics=(batch_sem,),        # pipeline (+ 2-TC shard on v7x)
            vmem_limit_bytes=32 * 1024 * 1024,       # explicit; safe on v5e/v6e/v7x
        ),
        cost_estimate=pl.CostEstimate(
            flops=flops, transcendentals=0, bytes_accessed=bytes_accessed),
    )(xt, w1r, b1r, w2r, b2r, w3tr, b3r)

    return out[:B]


def vector_field_reference(x, t, params):
    """Pure-JAX reference of the PyTorch forward for correctness checking."""
    w1, b1, w2, b2, w3, b3 = params
    xt = jnp.concatenate([x, t], axis=1)
    h = jnp.maximum(xt @ w1 + b1, 0.0)
    h = jnp.maximum(h @ w2 + b2, 0.0)
    return h @ w3 + b3


if __name__ == "__main__":
    key = jax.random.PRNGKey(0)
    kp, kx, kt = jax.random.split(key, 3)

    params = init_params(kp)

    B = 12                                              # small, non-multiple of 16: exercises the pad path
    x = jax.random.normal(kx, (B, 2), jnp.float32)      # 2-D sample positions
    t = jax.random.uniform(kt, (B, 1), jnp.float32)     # scalar time per sample

    ref = vector_field_reference(x, t, params)

    # f32 verification path (tolerance-equal, not bit-exact: layer-1 FMA order differs).
    out = vector_field_forward(x, t, params)
    out = jax.block_until_ready(out)
    assert out.shape == (B, 2)
    np.testing.assert_allclose(np.asarray(out), np.asarray(ref), rtol=1e-5, atol=1e-5)

    # bf16 production path (MXU layer-2 in bf16, f32 accumulate) — looser tolerance.
    out_bf16 = vector_field_forward(x, t, params, use_bf16=True)
    out_bf16 = jax.block_until_ready(out_bf16)
    np.testing.assert_allclose(np.asarray(out_bf16), np.asarray(ref), rtol=5e-2, atol=5e-2)

    print("KERNEL_OK")
</pallas_src>

<mosaic_0001>
module attributes {stable_mosaic.version = 11 : i64} {
  func.func @mlp_kernel(%arg0: i32, %arg1: memref<16x3xf32, #tpu.memory_space<vmem>>, %arg2: memref<3x64xf32, #tpu.memory_space<vmem>>, %arg3: memref<1x64xf32, #tpu.memory_space<vmem>>, %arg4: memref<64x64xf32, #tpu.memory_space<vmem>>, %arg5: memref<1x64xf32, #tpu.memory_space<vmem>>, %arg6: memref<2x64xf32, #tpu.memory_space<vmem>>, %arg7: memref<1x2xf32, #tpu.memory_space<vmem>>, %arg8: memref<16x2xf32, #tpu.memory_space<vmem>>) attributes {dimension_semantics = [#tpu.dimension_semantics<parallel>], iteration_bounds = array<i64: 1>, scalar_prefetch = 0 : i64, scratch_operands = 0 : i64, tpu.core_type = #tpu.core_type<tc>, window_params = [{transform_indices = @transform_0, window_bounds = array<i64: 16, 3>}, {pipeline_mode = #tpu.pipeline_mode<synchronous>, transform_indices = @transform_1, window_bounds = array<i64: 3, 64>}, {pipeline_mode = #tpu.pipeline_mode<synchronous>, transform_indices = @transform_2, window_bounds = array<i64: 1, 64>}, {pipeline_mode = #tpu.pipeline_mode<synchronous>, transform_indices = @transform_3, window_bounds = array<i64: 64, 64>}, {pipeline_mode = #tpu.pipeline_mode<synchronous>, transform_indices = @transform_4, window_bounds = array<i64: 1, 64>}, {pipeline_mode = #tpu.pipeline_mode<synchronous>, transform_indices = @transform_5, window_bounds = array<i64: 2, 64>}, {pipeline_mode = #tpu.pipeline_mode<synchronous>, transform_indices = @transform_6, window_bounds = array<i64: 1, 2>}, {transform_indices = @transform_7, window_bounds = array<i64: 16, 2>}]} {
    %c0 = arith.constant 0 : index
    %c0_0 = arith.constant 0 : index
    %0 = vector.load %arg1[%c0, %c0_0] : memref<16x3xf32, #tpu.memory_space<vmem>>, vector<16x3xf32>
    %c0_1 = arith.constant 0 : index
    %c0_2 = arith.constant 0 : index
    %1 = vector.load %arg2[%c0_1, %c0_2] : memref<3x64xf32, #tpu.memory_space<vmem>>, vector<3x64xf32>
    %2 = vector.extract_strided_slice %0 {offsets = [0, 0], sizes = [16, 1], strides = [1, 1]} : vector<16x3xf32> to vector<16x1xf32>
    %3 = vector.extract_strided_slice %1 {offsets = [0, 0], sizes = [1, 64], strides = [1, 1]} : vector<3x64xf32> to vector<1x64xf32>
    %4 = vector.broadcast %2 : vector<16x1xf32> to vector<16x64xf32>
    %5 = vector.broadcast %3 : vector<1x64xf32> to vector<16x64xf32>
    %6 = arith.mulf %4, %5 : vector<16x64xf32>
    %7 = vector.extract_strided_slice %0 {offsets = [0, 1], sizes = [16, 1], strides = [1, 1]} : vector<16x3xf32> to vector<16x1xf32>
    %8 = vector.extract_strided_slice %1 {offsets = [1, 0], sizes = [1, 64], strides = [1, 1]} : vector<3x64xf32> to vector<1x64xf32>
    %9 = vector.broadcast %7 : vector<16x1xf32> to vector<16x64xf32>
    %10 = vector.broadcast %8 : vector<1x64xf32> to vector<16x64xf32>
    %11 = arith.mulf %9, %10 : vector<16x64xf32>
    %12 = arith.addf %6, %11 : vector<16x64xf32>
    %13 = vector.extract_strided_slice %0 {offsets = [0, 2], sizes = [16, 1], strides = [1, 1]} : vector<16x3xf32> to vector<16x1xf32>
    %14 = vector.extract_strided_slice %1 {offsets = [2, 0], sizes = [1, 64], strides = [1, 1]} : vector<3x64xf32> to vector<1x64xf32>
    %15 = vector.broadcast %13 : vector<16x1xf32> to vector<16x64xf32>
    %16 = vector.broadcast %14 : vector<1x64xf32> to vector<16x64xf32>
    %17 = arith.mulf %15, %16 : vector<16x64xf32>
    %18 = arith.addf %12, %17 : vector<16x64xf32>
    %c0_3 = arith.constant 0 : index
    %c0_4 = arith.constant 0 : index
    %19 = vector.load %arg3[%c0_3, %c0_4] : memref<1x64xf32, #tpu.memory_space<vmem>>, vector<1x64xf32>
    %20 = vector.broadcast %19 : vector<1x64xf32> to vector<16x64xf32>
    %21 = arith.addf %18, %20 : vector<16x64xf32>
    %cst = arith.constant 0.000000e+00 : f32
    %22 = vector.broadcast %cst : f32 to vector<16x64xf32>
    %23 = arith.maximumf %21, %22 : vector<16x64xf32>
    %c0_5 = arith.constant 0 : index
    %c0_6 = arith.constant 0 : index
    %24 = vector.load %arg4[%c0_5, %c0_6] : memref<64x64xf32, #tpu.memory_space<vmem>>, vector<64x64xf32>
    %cst_7 = arith.constant dense<0.000000e+00> : vector<16x64xf32>
    %25 = tpu.matmul %23, %24, %cst_7 {dimension_numbers = #tpu.dot_dimension_numbers<[1], [0], [0], [1], [0, 0, 1, 1], [], []>} : vector<16x64xf32>, vector<64x64xf32>, vector<16x64xf32> -> vector<16x64xf32>
    %c0_8 = arith.constant 0 : index
    %c0_9 = arith.constant 0 : index
    %26 = vector.load %arg5[%c0_8, %c0_9] : memref<1x64xf32, #tpu.memory_space<vmem>>, vector<1x64xf32>
    %27 = vector.broadcast %26 : vector<1x64xf32> to vector<16x64xf32>
    %28 = arith.addf %25, %27 : vector<16x64xf32>
    %cst_10 = arith.constant 0.000000e+00 : f32
    %29 = vector.broadcast %cst_10 : f32 to vector<16x64xf32>
    %30 = arith.maximumf %28, %29 : vector<16x64xf32>
    %c0_11 = arith.constant 0 : index
    %c0_12 = arith.constant 0 : index
    %31 = vector.load %arg6[%c0_11, %c0_12] : memref<2x64xf32, #tpu.memory_space<vmem>>, vector<2x64xf32>
    %32 = vector.extract_strided_slice %31 {offsets = [0, 0], sizes = [1, 64], strides = [1, 1]} : vector<2x64xf32> to vector<1x64xf32>
    %33 = vector.broadcast %32 : vector<1x64xf32> to vector<16x64xf32>
    %34 = arith.mulf %30, %33 : vector<16x64xf32>
    %cst_13 = arith.constant dense<0.000000e+00> : vector<16xf32>
    %35 = vector.multi_reduction <add>, %34, %cst_13 [1] : vector<16x64xf32> to vector<16xf32>
    %36 = vector.shape_cast %35 : vector<16xf32> to vector<16x1xf32>
    %37 = vector.extract_strided_slice %31 {offsets = [1, 0], sizes = [1, 64], strides = [1, 1]} : vector<2x64xf32> to vector<1x64xf32>
    %38 = vector.broadcast %37 : vector<1x64xf32> to vector<16x64xf32>
    %39 = arith.mulf %30, %38 : vector<16x64xf32>
    %cst_14 = arith.constant dense<0.000000e+00> : vector<16xf32>
    %40 = vector.multi_reduction <add>, %39, %cst_14 [1] : vector<16x64xf32> to vector<16xf32>
    %41 = vector.shape_cast %40 : vector<16xf32> to vector<16x1xf32>
    %42 = tpu.concatenate %36, %41 in 1 : vector<16x1xf32>, vector<16x1xf32> -> vector<16x2xf32>
    %c0_15 = arith.constant 0 : index
    %c0_16 = arith.constant 0 : index
    %43 = vector.load %arg7[%c0_15, %c0_16] : memref<1x2xf32, #tpu.memory_space<vmem>>, vector<1x2xf32>
    %44 = vector.broadcast %43 : vector<1x2xf32> to vector<16x2xf32>
    %45 = arith.addf %42, %44 : vector<16x2xf32>
    %c0_17 = arith.constant 0 : index
    %c0_18 = arith.constant 0 : index
    %46 = vector.load %arg8[%c0_17, %c0_18] : memref<16x2xf32, #tpu.memory_space<vmem>>, vector<16x2xf32>
    tpu.vector_store %arg8[%c0_17, %c0_18], %45 {strides = array<i32>} : memref<16x2xf32, #tpu.memory_space<vmem>>, vector<16x2xf32>,
    return
  }
  func.func @transform_0(%arg0: i32) -> (i32, i32) {
    %c0_i32 = arith.constant 0 : i32
    %c0_i32_0 = arith.constant 0 : i32
    return %arg0, %c0_i32 : i32, i32
  }
  func.func @transform_1(%arg0: i32) -> (i32, i32) {
    %c0_i32 = arith.constant 0 : i32
    %c0_i32_0 = arith.constant 0 : i32
    %c0_i32_1 = arith.constant 0 : i32
    return %c0_i32, %c0_i32_0 : i32, i32
  }
  func.func @transform_2(%arg0: i32) -> (i32, i32) {
    %c0_i32 = arith.constant 0 : i32
    %c0_i32_0 = arith.constant 0 : i32
    %c0_i32_1 = arith.constant 0 : i32
    return %c0_i32, %c0_i32_0 : i32, i32
  }
  func.func @transform_3(%arg0: i32) -> (i32, i32) {
    %c0_i32 = arith.constant 0 : i32
    %c0_i32_0 = arith.constant 0 : i32
    %c0_i32_1 = arith.constant 0 : i32
    return %c0_i32, %c0_i32_0 : i32, i32
  }
  func.func @transform_4(%arg0: i32) -> (i32, i32) {
    %c0_i32 = arith.constant 0 : i32
    %c0_i32_0 = arith.constant 0 : i32
    %c0_i32_1 = arith.constant 0 : i32
    return %c0_i32, %c0_i32_0 : i32, i32
  }
  func.func @transform_5(%arg0: i32) -> (i32, i32) {
    %c0_i32 = arith.constant 0 : i32
    %c0_i32_0 = arith.constant 0 : i32
    %c0_i32_1 = arith.constant 0 : i32
    return %c0_i32, %c0_i32_0 : i32, i32
  }
  func.func @transform_6(%arg0: i32) -> (i32, i32) {
    %c0_i32 = arith.constant 0 : i32
    %c0_i32_0 = arith.constant 0 : i32
    %c0_i32_1 = arith.constant 0 : i32
    return %c0_i32, %c0_i32_0 : i32, i32
  }
  func.func @transform_7(%arg0: i32) -> (i32, i32) {
    %c0_i32 = arith.constant 0 : i32
    %c0_i32_0 = arith.constant 0 : i32
    return %arg0, %c0_i32 : i32, i32
  }
}

</mosaic_0001>

<bundles_post_ra>
// kernel: tpu_custom_call.1
= control target key start
LH: loop header
LB: loop body
LE: loop exit
PB: predicated region body
PF: predicated region fallthrough
CT: control target
= control target key end

     0   :  { %12 = vsyncpa [#allocation3], 0  ;;  %s332_s24 = smov [#allocation2]   ;;  %s423_s0 = inlined_call_operand.vmem [shape: f32[16,3], index: 0, kind: input, shape index: {}]   ;;  %s424_s1 = inlined_call_operand.vmem [shape: f32[3,64], index: 1, kind: input, shape index: {}]   ;;  %s425_s2 = inlined_call_operand.vmem [shape: f32[1,64], index: 2, kind: input, shape index: {}]   ;;  %s426_s3 = inlined_call_operand.hbm [shape: f32[64,64], index: 3, kind: input, shape index: {}]   ;;  %s427_s4 = inlined_call_operand.vmem [shape: f32[1,64], index: 4, kind: input, shape index: {}]   ;;  %s428_s5 = inlined_call_operand.vmem [shape: f32[2,64], index: 5, kind: input, shape index: {}]   ;;  %s429_s6 = inlined_call_operand.vmem [shape: f32[1,2], index: 6, kind: input, shape index: {}]   ;;  %s430_s7 = inlined_call_operand.vmem [shape: f32[16,2], index: 7, kind: output, shape index: {}]  }
   0x1   :  { %s24_s25 = sshll.u32 %s332_s24, 4  ;;  %s308_s28 = scalar_lea.hbm %s426_s3, 1024  ;;  %s25_s25 = int_to_ptr.vmem [resolvable:$true] %s24_s25 }
   0x2   :  { %p309_p0 = scmp.ne.s32.totalorder %s426_s3, %s308_s28  ;;  %p312_p1 = scmp.lt.u32.totalorder %s308_s28, %s426_s3 }
   0x4   :  { %p314_p2 = pnand %p312_p1, %p309_p0 }
   0x6   :  { %317 = shalt.err (!%p314_p2)
}
   0x7   :  { %s318_s10 = scalar_lea.vmem %s25_s25, 1024  ;;  %p323_p4 = scmp.lt.s32.totalorder %s25_s25, %s25_s25 }
   0x8   :  { %p319_p3 = scmp.ne.s32.totalorder %s25_s25, %s318_s10  ;;  %p324_p5 = scmp.lt.s32.totalorder %s318_s10, %s318_s10 }
   0xa   :  { %p325_p6 = por %p324_p5, %p323_p4 }
   0xc   :  { %p326_p7 = pnand %p325_p6, %p319_p3 }
   0xe   :  { %329 = shalt.err (!%p326_p7)
}
   0xf   :  { %s333_s11 = smov 128   ;;  %s334_s12 = smov 8  }
  0x10   :  { %30 = dma.hbm_to_vmem [thread:$0]  %s426_s3, 1024, %s25_s25, [#allocation3], %s333_s11, %s333_s11, %s334_s12  }
  0x11   :  { %330 = dma.done.wait [#allocation3], 1024  }
  0x12   :  { %331 = vsyncadd [#allocation3], 4294966272  ;;  %v335_v0 = vmov 0   ;;  %v41_v1 = vld [vmem:[%s423_s0 + $0x8] sm:$0xff]  ;;  %v40_v2 = vld [vmem:[%s423_s0] sm:$0xff]  ;;  %v336_v6 = vmov 1   ;;  %v53_v17 = vlaneseq }
  0x13   :  { %304 = vset.pattern.permute.xlu1 %v335_v0  ;;  %302 = vset.pattern.permute.xlu0 %v335_v0  ;;  %v102_v3 = vld [vmem:[#allocation2] sm:$0xff]  ;;  %v103_v4 = vld [vmem:[#allocation2 + $0x8] sm:$0xff]  ;;  %v104_v7 = vld [vmem:[#allocation2 + $0x10] sm:$0xff]  ;;  %v337_v12 = vmov 2   ;;  %vm117_vm0 = vcmask 523264   ;;  %vm226_vm1 = vcmask 7168  }
  0x14   :  { %50 = vperm.xlu1 %304, %v41_v1   ;;  %45 = vperm.xlu0 %302, %v40_v2   ;;  %v280_v5 = vpack.c.bf16 %v103_v4, %v102_v3  ;;  %v105_v8 = vld [vmem:[#allocation2 + $0x18] sm:$0xff]  ;;  %v106_v10 = vld [vmem:[#allocation2 + $0x20] sm:$0xff]  ;;  %v107_v11 = vld [vmem:[#allocation2 + $0x28] sm:$0xff]  ;;  %v54_v18 = vshrl.u32 %v53_v17, 7  ;;  %vm238_vm2 = vcmask 15360  }
  0x15   :  { %v284_v9 = vpack.c.bf16 %v105_v8, %v104_v7  ;;  %v288_v13 = vpack.c.bf16 %v107_v11, %v106_v10  ;;  %v108_v14 = vld [vmem:[#allocation2 + $0x30] sm:$0xff]  ;;  %v109_v15 = vld [vmem:[#allocation2 + $0x38] sm:$0xff]  ;;  %v42_v23 = vld [vmem:[%s424_s1] sm:$0x7] }
  0x16   :  { %281 = vmatprep.subr.bf16.mxu0 %v280_v5  ;;  %v292_v16 = vpack.c.bf16 %v109_v15, %v108_v14  ;;  %v69_v19 = vsub.s32 1, %v54_v18  ;;  %v55_v22 = vsub.s32 0, %v54_v18  ;;  %v85_v25 = vsub.s32 2, %v54_v18  ;;  %v246_v40 = vld [vmem:[%s425_s2] ss:$0 sm:$0xff] }
  0x17   :  { %283 = vmatpush3.bf16.msra.mxu0 %v280_v5  ;;  %v247_v47 = vld [vmem:[%s427_s4] ss:$0 sm:$0xff] }
  0x18   :  { %305 = vset.pattern.permute.xlu1 %v336_v6  ;;  %303 = vset.pattern.permute.xlu0 %v336_v6  ;;  %v70_v24 = vrot.slane %v42_v23, %v69_v19  ;;  %v56_v26 = vrot.slane %v42_v23, %v55_v22  ;;  %v86_v31 = vrot.slane %v42_v23, %v85_v25  ;;  %v201_v48 = vld [vmem:[%s428_s5] sm:$0x3] }
  0x19   :  { %64 = vperm.xlu1 %305, %v41_v1   ;;  %60 = vperm.xlu0 %303, %v40_v2   ;;  %v205_v52 = vrot.slane %v201_v48, %v55_v22  ;;  %v217_v55 = vrot.slane %v201_v48, %v69_v19  ;;  %v250_v3 = vld [vmem:[%s429_s6] ss:$0 sm:$0xff] }
  0x1a   :  { %285 = vmatprep.subr.bf16.mxu0 %v284_v9 }
  0x1b   :  { %287 = vmatpush3.bf16.msra.mxu0 %v284_v9 }
  0x1c   :  { %289 = vmatprep.subr.bf16.mxu0 %v288_v13 }
  0x1d   :  { %306 = vset.pattern.permute.xlu1 %v337_v12  ;;  %307 = vset.pattern.permute.xlu0 %v337_v12 }
  0x1e   :  { %76 = vperm.xlu1 %306, %v40_v2   ;;  %80 = vperm.xlu0 %307, %v41_v1  }
  0x1f   :  { %291 = vmatpush3.bf16.msra.mxu0 %v288_v13 }
  0x20   :  { %293 = vmatprep.subr.bf16.mxu0 %v292_v16 }
  0x23   :  { %295 = vmatpush3.bf16.msra.mxu0 %v292_v16 }
  0x93   :  { %v51_v20 = vpop.permute.xlu1 %50  ;;  %v46_v21 = vpop.permute.xlu0 %45 }
  0x94   :  { %v58_v32 = vmul.f32 %v56_v26, %v51_v20  ;;  %v57_v33 = vmul.f32 %v56_v26, %v46_v21 }
  0x98   :  { %v65_v27 = vpop.permute.xlu1 %64  ;;  %v61_v28 = vpop.permute.xlu0 %60 }
  0x99   :  { %v72_v29 = vmul.f32 %v70_v24, %v65_v27  ;;  %v71_v30 = vmul.f32 %v70_v24, %v61_v28 }
  0x9b   :  { %v74_v36 = vadd.f32 %v72_v29, %v58_v32  ;;  %v73_v37 = vadd.f32 %v71_v30, %v57_v33 }
  0x9d   :  { %v77_v34 = vpop.permute.xlu1 %76  ;;  %v81_v35 = vpop.permute.xlu0 %80 }
  0x9e   :  { %v87_v38 = vmul.f32 %v86_v31, %v77_v34  ;;  %v88_v39 = vmul.f32 %v86_v31, %v81_v35 }
  0xa0   :  { %v89_v41 = vadd.f32 %v87_v38, %v73_v37  ;;  %v90_v42 = vadd.f32 %v88_v39, %v74_v36 }
  0xa2   :  { %v98_v43 = vadd.f32 %v246_v40, %v89_v41  ;;  %v99_v44 = vadd.f32 %v246_v40, %v90_v42 }
  0xa4   :  { %v100_v45 = vmax.f32 %v98_v43, 0.0  ;;  %v101_v46 = vmax.f32 %v99_v44, 0.0 }
  0xa6   :  { %277 = vmatprep.mubr.msk.f32.mxu0 %vm117_vm0, %v100_v45 }
  0xa7   :  { %278 = vmatmul.mubr.msk.f32.vlgmr.msra.gmra.mrb[0].mxu0 %vm117_vm0, %v101_v46 }
 0x17a   :  { %v279_v49 = vpop.f32.mrb[0].mxu0 }
 0x17b   :  { %v196_v50 = vadd.f32 %v279_v49, %v247_v47  ;;  %v190_v51 = vpop.f32.mrb[1].mxu0 }
 0x17c   :  { %v191_v53 = vadd.f32 %v247_v47, %v190_v51 }
 0x17d   :  { %v200_v54 = vmax.f32 %v196_v50, 0.0 }
 0x17e   :  { %v199_v56 = vmax.f32 %v191_v53, 0.0 }
 0x17f   :  { %v207_v57 = vmul.f32 %v205_v52, %v200_v54  ;;  %v219_v60 = vmul.f32 %v217_v55, %v200_v54 }
 0x180   :  { %v206_v58 = vmul.f32 %v205_v52, %v199_v56  ;;  %v218_v62 = vmul.f32 %v217_v55, %v199_v56 }
 0x181   :  { %v211_v59 = vsel %vm117_vm0, %v207_v57, 0.0  ;;  %v223_v63 = vsel %vm117_vm0, %v219_v60, 0.0 }
 0x182   :  { %212 = vadd.xlane.f32.xlu0 %v211_v59  ;;  %v208_v61 = vsel %vm117_vm0, %v206_v58, 0.0  ;;  %v220_v0 = vsel %vm117_vm0, %v218_v62, 0.0 }
 0x183   :  { %209 = vadd.xlane.f32.xlu1 %v208_v61 }
 0x186   :  { %224 = vadd.xlane.f32.xlu0 %v223_v63 }
 0x187   :  { %221 = vadd.xlane.f32.xlu1 %v220_v0 }
 0x20f   :  { %v213_v1 = vpop.xlane.xlu0 %212 }
 0x210   :  { %v210_v2 = vpop.xlane.xlu1 %209 }
 0x213   :  { %v225_v4 = vpop.xlane.xlu0 %224 }
 0x214   :  { %v228_v5 = vsel %vm226_vm1, %v213_v1, %v225_v4  ;;  %v222_v6 = vpop.xlane.xlu1 %221 }
 0x215   :  { %v237_v7 = vadd.f32 %v250_v3, %v228_v5  ;;  %v227_v8 = vsel %vm226_vm1, %v210_v2, %v222_v6 }
 0x216   :  { %v236_v9 = vadd.f32 %v250_v3, %v227_v8 }
 0x217   :  { %240 = vst.msk [vmem:[%s430_s7 + $0x8] sm:$0xff] %vm238_vm2, %v237_v7 }
 0x218   :  { %239 = vst.msk [vmem:[%s430_s7] sm:$0xff] %vm238_vm2, %v236_v9 }
 0x219   :  { %245 = vsyncpa [#allocation3], 1 }

</bundles_post_ra>
